<compile_context>
chip_gen: v7x
topology: tpu7x:2x2x1
jax: 0.10.0
libtpu: 0.0.40
codegen_flags: <defaults>
</compile_context>

<pallas_src>
import functools

import jax
import jax.numpy as jnp
from jax.experimental import pallas as pl
from jax.experimental.pallas import tpu as pltpu

_OUT_SUB = 8    # logits padded to one sublane group (rows of the output slab)
_OPAD = 128     # lane-padded width of W2 so the second matmul is lane-dense


def _round_up(n, m):
    return ((n + m - 1) // m) * m


def mlp_kernel(x_ref, w1_ref, b1_ref, w2_ref, b2_ref, o_ref):
    # x tile arrives f32 (no wrapper pre-cast pass); cast to bf16 for the MXU.
    x = x_ref[...].astype(jnp.bfloat16)
    # hidden = relu(x @ W1 + b1): bf16 MXU inputs, f32 accumulate/bias/ReLU.
    h = jnp.dot(x, w1_ref[...], preferred_element_type=jnp.float32)
    h = jnp.maximum(h + b1_ref[...], 0.0)
    # logits = hidden @ W2 + b2 (W2/b2 zero-padded to 128 lanes).
    out = jnp.dot(h.astype(jnp.bfloat16), w2_ref[...],
                  preferred_element_type=jnp.float32)
    out = out + b2_ref[...]                                  # (TB, 128) f32
    # Transposed compact store: full-tile XLU transpose (TB,128)->(128,TB),
    # then an aligned 8-sublane slice.  Writeback is 8*TB*4 B per tile
    # (32 B/batch-row) instead of 128*TB*4 B, and the lane axis (TB) is dense.
    o_ref[...] = out.T[:_OUT_SUB, :].astype(o_ref.dtype)


def prepare_params(w1, b1, w2, b2):
    """One-time weight padding/casting, hoisted out of the per-call path."""
    _, H = w1.shape
    O = w2.shape[1]
    w2p = jnp.zeros((H, _OPAD), jnp.float32).at[:, :O].set(w2.astype(jnp.float32))
    b2p = jnp.zeros((1, _OPAD), jnp.float32).at[:, :O].set(
        jnp.asarray(b2, jnp.float32).reshape(1, O))
    return (w1.astype(jnp.bfloat16),
            jnp.asarray(b1, jnp.float32).reshape(1, H),
            w2p.astype(jnp.bfloat16),
            b2p)


@functools.partial(jax.jit, static_argnames=("num_outputs", "block_b"))
def multiclass_forward(x, w1b, b1f, w2pb, b2p, *, num_outputs, block_b=2048):
    """x: [B, F] f32; prepared params from prepare_params(); returns [B, num_outputs]."""
    B, F = x.shape
    H = w1b.shape[1]

    # Step count first (even when >1 so v7x's two TCs get balanced work),
    # then a 128-aligned tile size near block_b that minimises batch padding.
    n_steps = max(1, pl.cdiv(B, block_b))
    if n_steps > 1 and n_steps % 2:
        n_steps += 1
    TB = _round_up(pl.cdiv(B, n_steps), 128)
    Bp = n_steps * TB
    xp = x if Bp == B else jnp.pad(x, ((0, Bp - B), (0, 0)))

    flops = 2 * Bp * (F * H + H * _OPAD)
    bytes_accessed = (xp.size * 4 + w1b.size * 2 + b1f.size * 4
                      + w2pb.size * 2 + b2p.size * 4 + _OUT_SUB * Bp * 4)

    out_t = pl.pallas_call(
        mlp_kernel,
        out_shape=jax.ShapeDtypeStruct((_OUT_SUB, Bp), jnp.float32),
        grid=(n_steps,),
        in_specs=[
            pl.BlockSpec((TB, F), lambda i: (i, 0)),      # x: tiled over batch
            pl.BlockSpec((F, H), lambda i: (0, 0)),       # W1: VMEM-resident
            pl.BlockSpec((1, H), lambda i: (0, 0)),       # b1: VMEM-resident
            pl.BlockSpec((H, _OPAD), lambda i: (0, 0)),   # W2 (padded): resident
            pl.BlockSpec((1, _OPAD), lambda i: (0, 0)),   # b2 (padded): resident
        ],
        out_specs=pl.BlockSpec((_OUT_SUB, TB), lambda i: (0, i)),
        compiler_params=pltpu.CompilerParams(
            dimension_semantics=("parallel",),
            vmem_limit_bytes=32 * 1024 * 1024),
        cost_estimate=pl.CostEstimate(
            flops=flops, transcendentals=0, bytes_accessed=bytes_accessed),
    )(xp, w1b, b1f, w2pb, b2p)

    # (8, Bp) slab -> (B, num_outputs): tiny slice + transpose in the wrapper.
    return out_t[:num_outputs, :B].T


def init_params(key, in_features, hidden, num_outputs):
    # Deterministic init mimicking nn.Linear uniform(-1/sqrt(fan_in), 1/sqrt(fan_in)).
    k1, k2, k3, k4 = jax.random.split(key, 4)
    bound1 = 1.0 / jnp.sqrt(in_features)
    bound2 = 1.0 / jnp.sqrt(hidden)
    w1 = jax.random.uniform(k1, (in_features, hidden), jnp.float32, -bound1, bound1)
    b1 = jax.random.uniform(k2, (1, hidden), jnp.float32, -bound1, bound1)
    w2 = jax.random.uniform(k3, (hidden, num_outputs), jnp.float32, -bound2, bound2)
    b2 = jax.random.uniform(k4, (1, num_outputs), jnp.float32, -bound2, bound2)
    return w1, b1, w2, b2


def _reference(x, w1, b1, w2, b2):
    return jnp.maximum(x @ w1 + b1, 0.0) @ w2 + b2


if __name__ == "__main__":
    # Small shapes consistent with the module: PCA features -> 32 hidden -> classes.
    in_features = 4      # X_train.shape[1] (e.g. PCA components)
    hidden = 32
    num_outputs = 3      # len(np.unique(y))

    key = jax.random.PRNGKey(0)
    kx, kp, kx2 = jax.random.split(key, 3)
    w1, b1, w2, b2 = init_params(kp, in_features, hidden, num_outputs)

    # Weight padding / casting done once, not per call.
    params = prepare_params(w1, b1, w2, b2)

    # Small-batch path (single grid step, batch padded to one 128-row tile).
    batch = 8
    x = jax.random.normal(kx, (batch, in_features), jnp.float32)
    out = jax.block_until_ready(
        multiclass_forward(x, *params, num_outputs=num_outputs))
    ref = _reference(x, w1, b1, w2, b2)
    assert out.shape == (batch, num_outputs)
    # bf16 matmul inputs -> loosened tolerance vs full-f32 reference.
    assert jnp.allclose(out, ref, atol=2e-2, rtol=2e-2)

    # Larger batch exercising batch padding + transposed output slicing.
    batch2 = 1030
    x2 = jax.random.normal(kx2, (batch2, in_features), jnp.float32)
    out2 = jax.block_until_ready(
        multiclass_forward(x2, *params, num_outputs=num_outputs))
    ref2 = _reference(x2, w1, b1, w2, b2)
    assert out2.shape == (batch2, num_outputs)
    assert jnp.allclose(out2, ref2, atol=2e-2, rtol=2e-2)

    print("KERNEL_OK")
</pallas_src>

<mosaic_0001>
module attributes {stable_mosaic.version = 11 : i64} {
  func.func @mlp_kernel(%arg0: i32, %arg1: memref<128x4xf32, #tpu.memory_space<vmem>>, %arg2: memref<4x32xbf16, #tpu.memory_space<vmem>>, %arg3: memref<1x32xf32, #tpu.memory_space<vmem>>, %arg4: memref<32x128xbf16, #tpu.memory_space<vmem>>, %arg5: memref<1x128xf32, #tpu.memory_space<vmem>>, %arg6: memref<8x128xf32, #tpu.memory_space<vmem>>) attributes {dimension_semantics = [#tpu.dimension_semantics<parallel>], iteration_bounds = array<i64: 1>, scalar_prefetch = 0 : i64, scratch_operands = 0 : i64, tpu.core_type = #tpu.core_type<tc>, window_params = [{transform_indices = @transform_0, window_bounds = array<i64: 128, 4>}, {pipeline_mode = #tpu.pipeline_mode<synchronous>, transform_indices = @transform_1, window_bounds = array<i64: 4, 32>}, {pipeline_mode = #tpu.pipeline_mode<synchronous>, transform_indices = @transform_2, window_bounds = array<i64: 1, 32>}, {pipeline_mode = #tpu.pipeline_mode<synchronous>, transform_indices = @transform_3, window_bounds = array<i64: 32, 128>}, {pipeline_mode = #tpu.pipeline_mode<synchronous>, transform_indices = @transform_4, window_bounds = array<i64: 1, 128>}, {transform_indices = @transform_5, window_bounds = array<i64: 8, 128>}]} {
    %c0 = arith.constant 0 : index
    %c0_0 = arith.constant 0 : index
    %0 = vector.load %arg1[%c0, %c0_0] : memref<128x4xf32, #tpu.memory_space<vmem>>, vector<128x4xf32>
    %1 = arith.truncf %0 : vector<128x4xf32> to vector<128x4xbf16>
    %c0_1 = arith.constant 0 : index
    %c0_2 = arith.constant 0 : index
    %2 = vector.load %arg2[%c0_1, %c0_2] : memref<4x32xbf16, #tpu.memory_space<vmem>>, vector<4x32xbf16>
    %cst = arith.constant dense<0.000000e+00> : vector<128x32xf32>
    %3 = tpu.matmul %1, %2, %cst {dimension_numbers = #tpu.dot_dimension_numbers<[1], [0], [0], [1], [0, 0, 1, 1], [], []>} : vector<128x4xbf16>, vector<4x32xbf16>, vector<128x32xf32> -> vector<128x32xf32>
    %c0_3 = arith.constant 0 : index
    %c0_4 = arith.constant 0 : index
    %4 = vector.load %arg3[%c0_3, %c0_4] : memref<1x32xf32, #tpu.memory_space<vmem>>, vector<1x32xf32>
    %5 = vector.broadcast %4 : vector<1x32xf32> to vector<128x32xf32>
    %6 = arith.addf %3, %5 : vector<128x32xf32>
    %cst_5 = arith.constant 0.000000e+00 : f32
    %7 = vector.broadcast %cst_5 : f32 to vector<128x32xf32>
    %8 = arith.maximumf %6, %7 : vector<128x32xf32>
    %9 = arith.truncf %8 : vector<128x32xf32> to vector<128x32xbf16>
    %c0_6 = arith.constant 0 : index
    %c0_7 = arith.constant 0 : index
    %10 = vector.load %arg4[%c0_6, %c0_7] : memref<32x128xbf16, #tpu.memory_space<vmem>>, vector<32x128xbf16>
    %cst_8 = arith.constant dense<0.000000e+00> : vector<128x128xf32>
    %11 = tpu.matmul %9, %10, %cst_8 {dimension_numbers = #tpu.dot_dimension_numbers<[1], [0], [0], [1], [0, 0, 1, 1], [], []>} : vector<128x32xbf16>, vector<32x128xbf16>, vector<128x128xf32> -> vector<128x128xf32>
    %c0_9 = arith.constant 0 : index
    %c0_10 = arith.constant 0 : index
    %12 = vector.load %arg5[%c0_9, %c0_10] : memref<1x128xf32, #tpu.memory_space<vmem>>, vector<1x128xf32>
    %13 = vector.broadcast %12 : vector<1x128xf32> to vector<128x128xf32>
    %14 = arith.addf %11, %13 : vector<128x128xf32>
    %15 = tpu.transpose %14, [1, 0] : vector<128x128xf32> -> vector<128x128xf32>
    %16 = vector.extract_strided_slice %15 {offsets = [0, 0], sizes = [8, 128], strides = [1, 1]} : vector<128x128xf32> to vector<8x128xf32>
    %c0_11 = arith.constant 0 : index
    %c0_12 = arith.constant 0 : index
    %17 = vector.load %arg6[%c0_11, %c0_12] : memref<8x128xf32, #tpu.memory_space<vmem>>, vector<8x128xf32>
    tpu.vector_store %arg6[%c0_11, %c0_12], %16 {strides = array<i32>} : memref<8x128xf32, #tpu.memory_space<vmem>>, vector<8x128xf32>,
    return
  }
  func.func @transform_0(%arg0: i32) -> (i32, i32) {
    %c0_i32 = arith.constant 0 : i32
    %c0_i32_0 = arith.constant 0 : i32
    return %arg0, %c0_i32 : i32, i32
  }
  func.func @transform_1(%arg0: i32) -> (i32, i32) {
    %c0_i32 = arith.constant 0 : i32
    %c0_i32_0 = arith.constant 0 : i32
    %c0_i32_1 = arith.constant 0 : i32
    return %c0_i32, %c0_i32_0 : i32, i32
  }
  func.func @transform_2(%arg0: i32) -> (i32, i32) {
    %c0_i32 = arith.constant 0 : i32
    %c0_i32_0 = arith.constant 0 : i32
    %c0_i32_1 = arith.constant 0 : i32
    return %c0_i32, %c0_i32_0 : i32, i32
  }
  func.func @transform_3(%arg0: i32) -> (i32, i32) {
    %c0_i32 = arith.constant 0 : i32
    %c0_i32_0 = arith.constant 0 : i32
    %c0_i32_1 = arith.constant 0 : i32
    return %c0_i32, %c0_i32_0 : i32, i32
  }
  func.func @transform_4(%arg0: i32) -> (i32, i32) {
    %c0_i32 = arith.constant 0 : i32
    %c0_i32_0 = arith.constant 0 : i32
    %c0_i32_1 = arith.constant 0 : i32
    return %c0_i32, %c0_i32_0 : i32, i32
  }
  func.func @transform_5(%arg0: i32) -> (i32, i32) {
    %c0_i32 = arith.constant 0 : i32
    %c0_i32_0 = arith.constant 0 : i32
    return %c0_i32, %arg0 : i32, i32
  }
}

</mosaic_0001>

<bundles_post_ra>
// kernel: multiclass_forward.1
= control target key start
LH: loop header
LB: loop body
LE: loop exit
PB: predicated region body
PF: predicated region fallthrough
CT: control target
= control target key end

     0   :  { %vm78_vm0 = vcmask 1041408   ;;  %vm53_vm1 = vcmask 31744   ;;  %vm226_vm2 = vcmask 261120   ;;  %s577_s1 = inlined_call_operand.vmem [shape: bf16[4,32], index: 1, kind: input, shape index: {}]   ;;  %s578_s0 = inlined_call_operand.vmem [shape: f32[128,4], index: 0, kind: input, shape index: {}]   ;;  %s579_s3 = inlined_call_operand.vmem [shape: bf16[32,128], index: 3, kind: input, shape index: {}]   ;;  %s580_s2 = inlined_call_operand.vmem [shape: f32[1,32], index: 2, kind: input, shape index: {}]   ;;  %s581_s4 = inlined_call_operand.vmem [shape: f32[1,128], index: 4, kind: input, shape index: {}]   ;;  %s582_s5 = inlined_call_operand.vmem [shape: f32[8,128], index: 5, kind: output, shape index: {}]  }
   0x1   :  { %v45_v0 = vld [vmem:[%s577_s1] sm:$0x3]  ;;  %v22_v2 = vld [vmem:[%s578_s0 + $0x8] sm:$0xff]  ;;  %v23_v5 = vld [vmem:[%s578_s0 + $0x10] sm:$0xff] }
   0x2   :  { %v21_v1 = vld [vmem:[%s578_s0] sm:$0xff]  ;;  %462 = vmatprep.subr.msk.bf16.mxu0 %vm78_vm0, %v45_v0  ;;  %v80_v3 = vsel %vm78_vm0, %v45_v0, 0  ;;  %v24_v6 = vld [vmem:[%s578_s0 + $0x18] sm:$0xff]  ;;  %v26_v9 = vld [vmem:[%s578_s0 + $0x28] sm:$0xff] }
   0x3   :  { %v37_v4 = vpack.c.bf16 %v22_v2, %v21_v1  ;;  %v25_v7 = vld [vmem:[%s578_s0 + $0x20] sm:$0xff]  ;;  %425 = vmatpush3.bf16.msra.mxu0 %v80_v3  ;;  %v38_v8 = vpack.c.bf16 %v24_v6, %v23_v5  ;;  %v27_v11 = vld [vmem:[%s578_s0 + $0x30] sm:$0xff]  ;;  %v28_v12 = vld [vmem:[%s578_s0 + $0x38] sm:$0xff] }
   0x4   :  { %v39_v10 = vpack.c.bf16 %v26_v9, %v25_v7  ;;  %v29_v13 = vld [vmem:[%s578_s0 + $0x40] sm:$0xff]  ;;  %v30_v14 = vld [vmem:[%s578_s0 + $0x48] sm:$0xff]  ;;  %v40_v15 = vpack.c.bf16 %v28_v12, %v27_v11  ;;  %v31_v17 = vld [vmem:[%s578_s0 + $0x50] sm:$0xff] }
   0x5   :  { %426 = vmatprep.mubr.msk.bf16.mxu0 %vm53_vm1, %v37_v4  ;;  %v41_v16 = vpack.c.bf16 %v30_v14, %v29_v13  ;;  %v32_v18 = vld [vmem:[%s578_s0 + $0x58] sm:$0xff]  ;;  %v33_v19 = vld [vmem:[%s578_s0 + $0x60] sm:$0xff]  ;;  %v34_v20 = vld [vmem:[%s578_s0 + $0x68] sm:$0xff] }
   0x6   :  { %427 = vmatmul.mubr.msk.bf16.vlgmr.msra.gmra.mrb[0].mxu0 %vm53_vm1, %v38_v8  ;;  %v42_v21 = vpack.c.bf16 %v32_v18, %v31_v17  ;;  %v43_v22 = vpack.c.bf16 %v34_v20, %v33_v19  ;;  %v35_v23 = vld [vmem:[%s578_s0 + $0x70] sm:$0xff]  ;;  %v36_v24 = vld [vmem:[%s578_s0 + $0x78] sm:$0xff]  ;;  %v463_v26 = vld [vmem:[%s579_s3] sm:$0xff]  }
   0x7   :  { %430 = vmatprep.mubr.msk.bf16.mxu0 %vm53_vm1, %v39_v10  ;;  %v44_v25 = vpack.c.bf16 %v36_v24, %v35_v23  ;;  %442 = vmatprep.subr.bf16.mxu1 %v463_v26  ;;  %v464_v27 = vld [vmem:[%s579_s3 + $0x8] sm:$0xff]   ;;  %v385_v28 = vld [vmem:[%s580_s2] ss:$0 sm:$0xff] }
   0x8   :  { %443 = vmatpush3.bf16.msra.mxu1 %v463_v26 }
   0x9   :  { %444 = vmatprep.subr.bf16.mxu1 %v464_v27 }
   0xc   :  { %445 = vmatpush3.bf16.msra.mxu1 %v464_v27 }
   0xe   :  { %431 = vmatmul.mubr.msk.bf16.gmra.mrb[4].mxu0 %vm53_vm1, %v40_v15 }
   0xf   :  { %434 = vmatprep.mubr.msk.bf16.mxu0 %vm53_vm1, %v41_v16 }
  0x16   :  { %435 = vmatmul.mubr.msk.bf16.gmra.mrb[8].mxu0 %vm53_vm1, %v42_v21  ;;  %v394_v21 = vld [vmem:[%s581_s4] ss:$0 sm:$0xff] }
  0x17   :  { %438 = vmatprep.mubr.msk.bf16.mxu0 %vm53_vm1, %v43_v22 }
  0x1e   :  { %439 = vmatmul.mubr.msk.bf16.gmra.mrb[12].mxu0 %vm53_vm1, %v44_v25 }
  0xd9   :  { %v428_v29 = vpop.f32.mrb[0].mxu0 }
  0xda   :  { %v125_v30 = vadd.f32 %v428_v29, %v385_v28  ;;  %v116_v31 = vpop.f32.mrb[1].mxu0 }
  0xdb   :  { %v117_v32 = vadd.f32 %v385_v28, %v116_v31  ;;  %v429_v33 = vpop.f32.mrb[2].mxu0 }
  0xdc   :  { %v128_v34 = vadd.f32 %v429_v33, %v385_v28  ;;  %v119_v35 = vpop.f32.mrb[3].mxu0  ;;  %v181_v37 = vmax.f32 %v125_v30, 0.0 }
  0xdd   :  { %v120_v36 = vadd.f32 %v385_v28, %v119_v35  ;;  %v179_v39 = vmax.f32 %v117_v32, 0.0 }
  0xde   :  { %v182_v38 = vmax.f32 %v128_v34, 0.0 }
  0xdf   :  { %v180_v40 = vmax.f32 %v120_v36, 0.0 }
  0xe0   :  { %v196_v41 = vpack.c.bf16 %v182_v38, %v181_v37 }
  0xe1   :  { %v432_v42 = vpop.f32.mrb[4].mxu0  ;;  %v195_v43 = vpack.c.bf16 %v180_v40, %v179_v39 }
  0xe2   :  { %v141_v44 = vadd.f32 %v432_v42, %v385_v28  ;;  %v132_v45 = vpop.f32.mrb[5].mxu0 }
  0xe3   :  { %v133_v46 = vadd.f32 %v385_v28, %v132_v45  ;;  %446 = vmatprep.mubr.msk.bf16.mxu1 %vm226_vm2, %v195_v43  ;;  %v433_v47 = vpop.f32.mrb[6].mxu0 }
  0xe4   :  { %v185_v48 = vmax.f32 %v141_v44, 0.0  ;;  %v144_v49 = vadd.f32 %v433_v47, %v385_v28  ;;  %447 = vmatmul.mubr.msk.bf16.vlgmr.msra.gmra.mrb[0].mxu1 %vm226_vm2, %v196_v41  ;;  %v135_v50 = vpop.f32.mrb[7].mxu0 }
  0xe5   :  { %v183_v51 = vmax.f32 %v133_v46, 0.0  ;;  %v136_v52 = vadd.f32 %v385_v28, %v135_v50 }
  0xe6   :  { %v186_v53 = vmax.f32 %v144_v49, 0.0 }
  0xe7   :  { %v184_v54 = vmax.f32 %v136_v52, 0.0 }
  0xe8   :  { %v198_v55 = vpack.c.bf16 %v186_v53, %v185_v48 }
  0xe9   :  { %v197_v56 = vpack.c.bf16 %v184_v54, %v183_v51  ;;  %v436_v57 = vpop.f32.mrb[8].mxu0 }
  0xea   :  { %v157_v58 = vadd.f32 %v436_v57, %v385_v28  ;;  %v148_v59 = vpop.f32.mrb[9].mxu0 }
  0xeb   :  { %450 = vmatprep.mubr.msk.bf16.mxu1 %vm226_vm2, %v197_v56  ;;  %v149_v60 = vadd.f32 %v385_v28, %v148_v59  ;;  %v437_v61 = vpop.f32.mrb[10].mxu0 }
  0xec   :  { %451 = vmatmul.mubr.msk.bf16.gmra.mrb[4].mxu1 %vm226_vm2, %v198_v55  ;;  %v189_v62 = vmax.f32 %v157_v58, 0.0  ;;  %v160_v63 = vadd.f32 %v437_v61, %v385_v28  ;;  %v151_v0 = vpop.f32.mrb[11].mxu0 }
  0xed   :  { %v187_v1 = vmax.f32 %v149_v60, 0.0  ;;  %v152_v2 = vadd.f32 %v385_v28, %v151_v0 }
  0xee   :  { %v190_v3 = vmax.f32 %v160_v63, 0.0 }
  0xef   :  { %v188_v4 = vmax.f32 %v152_v2, 0.0 }
  0xf0   :  { %v200_v5 = vpack.c.bf16 %v190_v3, %v189_v62 }
  0xf1   :  { %v199_v6 = vpack.c.bf16 %v188_v4, %v187_v1  ;;  %v440_v7 = vpop.f32.mrb[12].mxu0 }
  0xf2   :  { %v173_v8 = vadd.f32 %v440_v7, %v385_v28  ;;  %v164_v9 = vpop.f32.mrb[13].mxu0 }
  0xf3   :  { %454 = vmatprep.mubr.msk.bf16.mxu1 %vm226_vm2, %v199_v6  ;;  %v165_v10 = vadd.f32 %v385_v28, %v164_v9  ;;  %v441_v11 = vpop.f32.mrb[14].mxu0 }
  0xf4   :  { %455 = vmatmul.mubr.msk.bf16.gmra.mrb[8].mxu1 %vm226_vm2, %v200_v5  ;;  %v193_v12 = vmax.f32 %v173_v8, 0.0  ;;  %v176_v13 = vadd.f32 %v441_v11, %v385_v28  ;;  %v167_v14 = vpop.f32.mrb[15].mxu0 }
  0xf5   :  { %v191_v15 = vmax.f32 %v165_v10, 0.0  ;;  %v168_v16 = vadd.f32 %v385_v28, %v167_v14 }
  0xf6   :  { %v194_v17 = vmax.f32 %v176_v13, 0.0 }
  0xf7   :  { %v192_v18 = vmax.f32 %v168_v16, 0.0 }
  0xf8   :  { %v202_v19 = vpack.c.bf16 %v194_v17, %v193_v12 }
  0xf9   :  { %v201_v20 = vpack.c.bf16 %v192_v18, %v191_v15 }
  0xfb   :  { %458 = vmatprep.mubr.msk.bf16.mxu1 %vm226_vm2, %v201_v20 }
  0xfc   :  { %459 = vmatmul.mubr.msk.bf16.gmra.mrb[12].mxu1 %vm226_vm2, %v202_v19 }
 0x1b7   :  { %v448_v22 = vpop.f32.mrb[0].mxu1 }
 0x1b8   :  { %v285_v23 = vpop.f32.mrb[1].mxu1  ;;  %v294_v30 = vadd.f32 %v448_v22, %v394_v21 }
 0x1b9   :  { %v449_v24 = vpop.f32.mrb[2].mxu1  ;;  %v286_v25 = vadd.f32 %v394_v21, %v285_v23 }
 0x1ba   :  { %v288_v26 = vpop.f32.mrb[3].mxu1  ;;  %v297_v33 = vadd.f32 %v449_v24, %v394_v21 }
 0x1bb   :  { %348 = vxpose.xlu0.b32.start [1/16] (narrow) %v286_v25, 8  ;;  %v289_v27 = vadd.f32 %v394_v21, %v288_v26 }
 0x1bf   :  { %349 = vxpose.xlu0.b32.cont [2/16] (narrow) %v289_v27, 8  ;;  %v452_v28 = vpop.f32.mrb[4].mxu1 }
 0x1c0   :  { %v301_v29 = vpop.f32.mrb[5].mxu1  ;;  %v310_v42 = vadd.f32 %v452_v28, %v394_v21 }
 0x1c1   :  { %v453_v31 = vpop.f32.mrb[6].mxu1  ;;  %v302_v36 = vadd.f32 %v394_v21, %v301_v29 }
 0x1c2   :  { %v304_v32 = vpop.f32.mrb[7].mxu1  ;;  %v313_v45 = vadd.f32 %v453_v31, %v394_v21 }
 0x1c3   :  { %350 = vxpose.xlu0.b32.cont [3/16] (narrow) %v294_v30, 8  ;;  %v305_v39 = vadd.f32 %v394_v21, %v304_v32 }
 0x1c7   :  { %351 = vxpose.xlu0.b32.cont [4/16] (narrow) %v297_v33, 8  ;;  %v456_v34 = vpop.f32.mrb[8].mxu1 }
 0x1c8   :  { %v317_v35 = vpop.f32.mrb[9].mxu1  ;;  %v326_v48 = vadd.f32 %v456_v34, %v394_v21 }
 0x1c9   :  { %v457_v37 = vpop.f32.mrb[10].mxu1  ;;  %v318_v46 = vadd.f32 %v394_v21, %v317_v35 }
 0x1ca   :  { %v320_v38 = vpop.f32.mrb[11].mxu1  ;;  %v329_v49 = vadd.f32 %v457_v37, %v394_v21 }
 0x1cb   :  { %352 = vxpose.xlu0.b32.cont [5/16] (narrow) %v302_v36, 8  ;;  %v321_v47 = vadd.f32 %v394_v21, %v320_v38 }
 0x1cf   :  { %353 = vxpose.xlu0.b32.cont [6/16] (narrow) %v305_v39, 8  ;;  %v460_v40 = vpop.f32.mrb[12].mxu1 }
 0x1d0   :  { %v333_v41 = vpop.f32.mrb[13].mxu1  ;;  %v342_v52 = vadd.f32 %v460_v40, %v394_v21 }
 0x1d1   :  { %v461_v43 = vpop.f32.mrb[14].mxu1  ;;  %v334_v50 = vadd.f32 %v394_v21, %v333_v41 }
 0x1d2   :  { %v336_v44 = vpop.f32.mrb[15].mxu1  ;;  %v345_v53 = vadd.f32 %v461_v43, %v394_v21 }
 0x1d3   :  { %354 = vxpose.xlu0.b32.cont [7/16] (narrow) %v310_v42, 8  ;;  %v337_v51 = vadd.f32 %v394_v21, %v336_v44 }
 0x1d7   :  { %355 = vxpose.xlu0.b32.cont [8/16] (narrow) %v313_v45, 8 }
 0x1db   :  { %356 = vxpose.xlu0.b32.cont [9/16] (narrow) %v318_v46, 8 }
 0x1df   :  { %357 = vxpose.xlu0.b32.cont [10/16] (narrow) %v321_v47, 8 }
 0x1e3   :  { %358 = vxpose.xlu0.b32.cont [11/16] (narrow) %v326_v48, 8 }
 0x1e7   :  { %359 = vxpose.xlu0.b32.cont [12/16] (narrow) %v329_v49, 8 }
 0x1eb   :  { %360 = vxpose.xlu0.b32.cont [13/16] (narrow) %v334_v50, 8 }
 0x1ef   :  { %361 = vxpose.xlu0.b32.cont [14/16] (narrow) %v337_v51, 8 }
 0x1f3   :  { %362 = vxpose.xlu0.b32.cont [15/16] (narrow) %v342_v52, 8 }
 0x1f7   :  { %363 = vxpose.xlu0.b32.end [16/16] (narrow) %v345_v53, 8 }
 0x23b   :  { %v364_v54 = vpop.trf.xlu0 }
 0x23c   :  { %380 = vst [vmem:[%s582_s5] sm:$0xff] %v364_v54 }

</bundles_post_ra>
